<compile_context>
chip_gen: v7x
topology: tpu7x:2x2x1
jax: 0.10.0
libtpu: 0.0.40
codegen_flags: <defaults>
</compile_context>

<pallas_src>
import functools

import numpy as np
import jax
import jax.numpy as jnp
from jax.experimental import pallas as pl
from jax.experimental.pallas import tpu as pltpu

_MEAN = (0.0, 0.0, 0.0, 0.0)
_STD = (0.1, 0.1, 0.2, 0.2)
_LANES = 128


def _bbox_kernel(const_ref, boxes_ref, deltas_ref, out_ref, *, add_mean):
    """boxes/deltas/out: (TR, 128) tiles — flat row-major views of (..., 4).

    Lane l holds coordinate c = l % 4 of some anchor; all four coordinates of
    one anchor occupy lanes 4k..4k+3 of a single 128-lane row, so all
    cross-coordinate traffic is two lane rotations (+-2) on the XLU.  The
    lane pattern (std, mean, +-1 sign, -+0.5 half, min-lane flag) comes from
    a baked constant slab — no iota / compare ladders on the VPU.
    const_ref rows: 0=std, 1=mean, 2=sign(+1 min/-1 max), 3=half(-0.5/+0.5),
    4=is_min flag (1.0 on x1/y1 lanes, 0.0 on x2/y2 lanes).
    """
    b = boxes_ref[...].astype(jnp.float32)
    d = deltas_ref[...].astype(jnp.float32)
    shape = b.shape
    lanes = shape[-1]

    # Hoisted broadcasts of the (1,128) constant rows (sublane broadcast).
    std_b = jnp.broadcast_to(const_ref[0:1, :], shape)
    sign_b = jnp.broadcast_to(const_ref[2:3, :], shape)
    half_b = jnp.broadcast_to(const_ref[3:4, :], shape)
    min_b = jnp.broadcast_to(const_ref[4:5, :], shape) > 0.5   # x1/y1 (dx/dy) lanes

    scaled = d * std_b                          # dx,dy,dw,dh (normalized) in place
    if add_mean:
        scaled = scaled + jnp.broadcast_to(const_ref[1:2, :], shape)

    # Partner coordinate: lane i <-> lane i^2 inside each 4-lane anchor group.
    fwd_b = pltpu.roll(b, lanes - 2, axis=1)    # fwd[i] = b[(i + 2) % lanes]
    bwd_b = pltpu.roll(b, 2, axis=1)            # bwd[i] = b[(i - 2) % lanes]
    b_sw = jnp.where(min_b, fwd_b, bwd_b)       # x2,y2 on min lanes; x1,y1 on max

    ctr = 0.5 * (b + b_sw)                      # ctr_x / ctr_y on every lane
    size = sign_b * (b_sw - b)                  # width / height on every lane

    fwd_s = pltpu.roll(scaled, lanes - 2, axis=1)
    bwd_s = pltpu.roll(scaled, 2, axis=1)
    trans = jnp.where(min_b, scaled, bwd_s)     # dx / dy on every lane
    scale = jnp.where(min_b, fwd_s, scaled)     # dw / dh on every lane

    pred_ctr = ctr + trans * size
    pred_size = jnp.exp(scale) * size
    out_ref[...] = (pred_ctr + half_b * pred_size).astype(out_ref.dtype)


def _lane_consts(mean, std):
    mean = np.asarray(mean, np.float32).reshape(4)
    std = np.asarray(std, np.float32).reshape(4)
    c = np.arange(_LANES) % 4
    is_min = c < 2
    const = np.zeros((8, _LANES), np.float32)
    const[0] = std[c]
    const[1] = mean[c]
    const[2] = np.where(is_min, 1.0, -1.0)
    const[3] = np.where(is_min, -0.5, 0.5)
    const[4] = is_min.astype(np.float32)
    return jnp.asarray(const)


def _decode_small(boxes4, deltas4, mean, std):
    """Pure-JAX decode for (n, 4) tails (< 32 anchors); computed in f32."""
    mean = jnp.asarray(mean, jnp.float32)
    std = jnp.asarray(std, jnp.float32)
    b = boxes4.astype(jnp.float32)
    d = deltas4.astype(jnp.float32)
    w = b[:, 2] - b[:, 0]
    h = b[:, 3] - b[:, 1]
    cx = b[:, 0] + 0.5 * w
    cy = b[:, 1] + 0.5 * h
    dx = d[:, 0] * std[0] + mean[0]
    dy = d[:, 1] * std[1] + mean[1]
    dw = d[:, 2] * std[2] + mean[2]
    dh = d[:, 3] * std[3] + mean[3]
    pcx = cx + dx * w
    pcy = cy + dy * h
    pw = jnp.exp(dw) * w
    ph = jnp.exp(dh) * h
    return jnp.stack([pcx - 0.5 * pw, pcy - 0.5 * ph,
                      pcx + 0.5 * pw, pcy + 0.5 * ph], axis=1)


def bbox_transform(boxes, deltas, mean=_MEAN, std=_STD, *, block_rows=2048):
    """boxes, deltas: (..., 4) -> (..., 4); PyTorch BBoxTransform semantics."""
    assert boxes.shape == deltas.shape and boxes.shape[-1] == 4
    orig_shape = boxes.shape

    def _prep(x):
        # Keep f32 / bf16 end-to-end (pure bandwidth kernel); cast only
        # unsupported dtypes.  Reshape of a contiguous buffer is free.
        if x.dtype != jnp.float32 and x.dtype != jnp.bfloat16:
            x = x.astype(jnp.float32)
        return x.reshape(-1)

    flat_b = _prep(boxes)
    flat_d = _prep(deltas)
    out_dtype = np.dtype(jnp.result_type(flat_b.dtype, flat_d.dtype))

    total = flat_b.size                       # multiple of 4 (whole anchors)
    rows = total // _LANES                    # full 128-lane rows (32 anchors each)
    main = rows * _LANES
    tail = total - main                       # leftover anchors (<32): JAX epilogue,
                                              # no full-slab pad copy.
    pieces = []
    if rows > 0:
        slab_b = flat_b[:main].reshape(rows, _LANES)   # lane-dense slab view
        slab_d = flat_d[:main].reshape(rows, _LANES)

        if rows <= 256:
            tr = rows                          # single step, full-extent block
        else:
            # Aim for >= 8 grid steps (>= 4 per v7x TensorCore) with a
            # 256-row floor; 16-sublane aligned (covers f32 and bf16 packing);
            # capped at block_rows (1 MiB/array at 2048 -> safe scoped VMEM
            # on v5e/v6e/v7x even if Mosaic materializes a few temporaries).
            want = (rows + 7) // 8
            want = ((want + 15) // 16) * 16
            tr = min(block_rows, max(256, want))
        grid = ((rows + tr - 1) // tr,)

        add_mean = bool(any(float(m) != 0.0 for m in np.asarray(mean, np.float32)))
        const = _lane_consts(mean, std)
        kernel = functools.partial(_bbox_kernel, add_mean=add_mean)

        tile_spec = pl.BlockSpec((tr, _LANES), lambda i: (i, 0))
        bytes_io = rows * _LANES * (slab_b.dtype.itemsize
                                    + slab_d.dtype.itemsize
                                    + out_dtype.itemsize) + int(const.size) * 4
        out_slab = pl.pallas_call(
            kernel,
            out_shape=jax.ShapeDtypeStruct((rows, _LANES), out_dtype),
            grid=grid,
            in_specs=[pl.BlockSpec((8, _LANES), lambda i: (0, 0)),   # constants
                      tile_spec, tile_spec],
            out_specs=tile_spec,
            compiler_params=pltpu.CompilerParams(
                dimension_semantics=("parallel",)),
            cost_estimate=pl.CostEstimate(
                flops=16 * rows * _LANES,
                transcendentals=rows * _LANES,
                bytes_accessed=bytes_io),
        )(const, slab_b, slab_d)
        pieces.append(out_slab.reshape(-1))

    if tail:
        # TODO(synk): unaligned tails (B*N % 32 != 0) take a prefix-slice +
        # tiny JAX epilogue; prefer sizing N to a multiple of 32 upstream.
        tail_out = _decode_small(flat_b[main:].reshape(-1, 4),
                                 flat_d[main:].reshape(-1, 4), mean, std)
        pieces.append(tail_out.reshape(-1).astype(out_dtype))

    out_flat = pieces[0] if len(pieces) == 1 else jnp.concatenate(pieces)
    return out_flat.reshape(orig_shape)


def _reference(boxes, deltas, mean=_MEAN, std=_STD):
    mean = jnp.asarray(mean, jnp.float32)
    std = jnp.asarray(std, jnp.float32)
    boxes = boxes.astype(jnp.float32)
    deltas = deltas.astype(jnp.float32)
    widths = boxes[:, :, 2] - boxes[:, :, 0]
    heights = boxes[:, :, 3] - boxes[:, :, 1]
    ctr_x = boxes[:, :, 0] + 0.5 * widths
    ctr_y = boxes[:, :, 1] + 0.5 * heights
    dx = deltas[:, :, 0] * std[0] + mean[0]
    dy = deltas[:, :, 1] * std[1] + mean[1]
    dw = deltas[:, :, 2] * std[2] + mean[2]
    dh = deltas[:, :, 3] * std[3] + mean[3]
    pred_ctr_x = ctr_x + dx * widths
    pred_ctr_y = ctr_y + dy * heights
    pred_w = jnp.exp(dw) * widths
    pred_h = jnp.exp(dh) * heights
    return jnp.stack(
        [pred_ctr_x - 0.5 * pred_w, pred_ctr_y - 0.5 * pred_h,
         pred_ctr_x + 0.5 * pred_w, pred_ctr_y + 0.5 * pred_h], axis=2)


if __name__ == "__main__":
    key = jax.random.PRNGKey(0)
    k1, k2, k3 = jax.random.split(key, 3)

    def make_inputs(B, N, dtype=jnp.float32):
        # Well-formed boxes (x1 < x2, y1 < y2), deterministic.
        xy = jax.random.uniform(k1, (B, N, 2), jnp.float32, 0.0, 50.0)
        wh = jax.random.uniform(k2, (B, N, 2), jnp.float32, 1.0, 30.0)
        boxes = jnp.concatenate([xy, xy + wh], axis=-1).astype(dtype)
        deltas = jax.random.normal(k3, (B, N, 4), jnp.float32).astype(dtype)
        return boxes, deltas

    # 1) Aligned case -> pure kernel path (rows = 8).
    boxes, deltas = make_inputs(2, 128)
    out = jax.block_until_ready(bbox_transform(boxes, deltas))
    ref = _reference(boxes, deltas)
    assert out.shape == (2, 128, 4) and out.dtype == jnp.float32
    assert jnp.allclose(out, ref, atol=1e-5, rtol=1e-5)

    # 2) Unaligned case -> kernel (rows = 12) + pure-JAX tail (16 anchors).
    boxes2, deltas2 = make_inputs(2, 200)
    out2 = jax.block_until_ready(bbox_transform(boxes2, deltas2))
    ref2 = _reference(boxes2, deltas2)
    assert out2.shape == (2, 200, 4)
    assert jnp.allclose(out2, ref2, atol=1e-5, rtol=1e-5)

    # 3) bf16 end-to-end (f32 in-register compute; only the store rounds).
    boxes3, deltas3 = make_inputs(2, 128, jnp.bfloat16)
    out3 = jax.block_until_ready(bbox_transform(boxes3, deltas3))
    ref3 = _reference(boxes3, deltas3)
    assert out3.dtype == jnp.bfloat16
    assert jnp.allclose(out3.astype(jnp.float32), ref3, atol=0.5, rtol=0.02)

    print("KERNEL_OK")
</pallas_src>

<mosaic_0001>
module attributes {stable_mosaic.version = 11 : i64} {
  func.func @_bbox_kernel(%arg0: i32, %arg1: memref<8x128xf32, #tpu.memory_space<vmem>>, %arg2: memref<8x128xf32, #tpu.memory_space<vmem>>, %arg3: memref<8x128xf32, #tpu.memory_space<vmem>>, %arg4: memref<8x128xf32, #tpu.memory_space<vmem>>) attributes {dimension_semantics = [#tpu.dimension_semantics<parallel>], iteration_bounds = array<i64: 1>, scalar_prefetch = 0 : i64, scratch_operands = 0 : i64, tpu.core_type = #tpu.core_type<tc>, window_params = [{pipeline_mode = #tpu.pipeline_mode<synchronous>, transform_indices = @transform_0, window_bounds = array<i64: 8, 128>}, {transform_indices = @transform_1, window_bounds = array<i64: 8, 128>}, {transform_indices = @transform_2, window_bounds = array<i64: 8, 128>}, {transform_indices = @transform_3, window_bounds = array<i64: 8, 128>}]} {
    %c0 = arith.constant 0 : index
    %c0_0 = arith.constant 0 : index
    %0 = vector.load %arg2[%c0, %c0_0] : memref<8x128xf32, #tpu.memory_space<vmem>>, vector<8x128xf32>
    %c0_1 = arith.constant 0 : index
    %c0_2 = arith.constant 0 : index
    %1 = vector.load %arg3[%c0_1, %c0_2] : memref<8x128xf32, #tpu.memory_space<vmem>>, vector<8x128xf32>
    %c0_3 = arith.constant 0 : index
    %c0_4 = arith.constant 0 : index
    %2 = vector.load %arg1[%c0_3, %c0_4] : memref<8x128xf32, #tpu.memory_space<vmem>>, vector<1x128xf32>
    %3 = vector.shape_cast %2 : vector<1x128xf32> to vector<1x128xf32>
    %4 = vector.broadcast %3 : vector<1x128xf32> to vector<8x128xf32>
    %c2 = arith.constant 2 : index
    %c0_5 = arith.constant 0 : index
    %5 = vector.load %arg1[%c2, %c0_5] : memref<8x128xf32, #tpu.memory_space<vmem>>, vector<1x128xf32>
    %6 = vector.shape_cast %5 : vector<1x128xf32> to vector<1x128xf32>
    %7 = vector.broadcast %6 : vector<1x128xf32> to vector<8x128xf32>
    %c3 = arith.constant 3 : index
    %c0_6 = arith.constant 0 : index
    %8 = vector.load %arg1[%c3, %c0_6] : memref<8x128xf32, #tpu.memory_space<vmem>>, vector<1x128xf32>
    %9 = vector.shape_cast %8 : vector<1x128xf32> to vector<1x128xf32>
    %10 = vector.broadcast %9 : vector<1x128xf32> to vector<8x128xf32>
    %c4 = arith.constant 4 : index
    %c0_7 = arith.constant 0 : index
    %11 = vector.load %arg1[%c4, %c0_7] : memref<8x128xf32, #tpu.memory_space<vmem>>, vector<1x128xf32>
    %12 = vector.shape_cast %11 : vector<1x128xf32> to vector<1x128xf32>
    %13 = vector.broadcast %12 : vector<1x128xf32> to vector<8x128xf32>
    %cst = arith.constant 5.000000e-01 : f32
    %14 = vector.broadcast %cst : f32 to vector<8x128xf32>
    %15 = arith.cmpf ogt, %13, %14 : vector<8x128xf32>
    %16 = arith.mulf %1, %4 : vector<8x128xf32>
    %c126_i32 = arith.constant 126 : i32
    %17 = tpu.dynamic_rotate %0 by %c126_i32 dim 1 : vector<8x128xf32>, i32 -> vector<8x128xf32>
    %c2_i32 = arith.constant 2 : i32
    %18 = tpu.dynamic_rotate %0 by %c2_i32 dim 1 : vector<8x128xf32>, i32 -> vector<8x128xf32>
    %19 = arith.select %15, %17, %18 : vector<8x128xi1>, vector<8x128xf32>
    %20 = arith.addf %0, %19 : vector<8x128xf32>
    %cst_8 = arith.constant 5.000000e-01 : f32
    %21 = vector.broadcast %cst_8 : f32 to vector<8x128xf32>
    %22 = arith.mulf %21, %20 : vector<8x128xf32>
    %23 = arith.subf %19, %0 : vector<8x128xf32>
    %24 = arith.mulf %7, %23 : vector<8x128xf32>
    %c126_i32_9 = arith.constant 126 : i32
    %25 = tpu.dynamic_rotate %16 by %c126_i32_9 dim 1 : vector<8x128xf32>, i32 -> vector<8x128xf32>
    %c2_i32_10 = arith.constant 2 : i32
    %26 = tpu.dynamic_rotate %16 by %c2_i32_10 dim 1 : vector<8x128xf32>, i32 -> vector<8x128xf32>
    %27 = arith.select %15, %16, %26 : vector<8x128xi1>, vector<8x128xf32>
    %28 = arith.select %15, %25, %16 : vector<8x128xi1>, vector<8x128xf32>
    %29 = arith.mulf %27, %24 : vector<8x128xf32>
    %30 = arith.addf %22, %29 : vector<8x128xf32>
    %31 = math.exp %28 : vector<8x128xf32>
    %32 = arith.mulf %31, %24 : vector<8x128xf32>
    %33 = arith.mulf %10, %32 : vector<8x128xf32>
    %34 = arith.addf %30, %33 : vector<8x128xf32>
    %c0_11 = arith.constant 0 : index
    %c0_12 = arith.constant 0 : index
    %35 = vector.load %arg4[%c0_11, %c0_12] : memref<8x128xf32, #tpu.memory_space<vmem>>, vector<8x128xf32>
    tpu.vector_store %arg4[%c0_11, %c0_12], %34 {strides = array<i32>} : memref<8x128xf32, #tpu.memory_space<vmem>>, vector<8x128xf32>,
    return
  }
  func.func @transform_0(%arg0: i32) -> (i32, i32) {
    %c0_i32 = arith.constant 0 : i32
    %c0_i32_0 = arith.constant 0 : i32
    %c0_i32_1 = arith.constant 0 : i32
    return %c0_i32, %c0_i32_0 : i32, i32
  }
  func.func @transform_1(%arg0: i32) -> (i32, i32) {
    %c0_i32 = arith.constant 0 : i32
    %c0_i32_0 = arith.constant 0 : i32
    return %arg0, %c0_i32 : i32, i32
  }
  func.func @transform_2(%arg0: i32) -> (i32, i32) {
    %c0_i32 = arith.constant 0 : i32
    %c0_i32_0 = arith.constant 0 : i32
    return %arg0, %c0_i32 : i32, i32
  }
  func.func @transform_3(%arg0: i32) -> (i32, i32) {
    %c0_i32 = arith.constant 0 : i32
    %c0_i32_0 = arith.constant 0 : i32
    return %arg0, %c0_i32 : i32, i32
  }
}

</mosaic_0001>

<bundles_post_ra>
// kernel: tpu_custom_call.1
= control target key start
LH: loop header
LB: loop body
LE: loop exit
PB: predicated region body
PF: predicated region fallthrough
CT: control target
= control target key end

     0   :  { %8 = vsyncpa [#allocation3], 0  ;;  %s293_s0 = inlined_call_operand.hbm [shape: f32[8,128], index: 0, kind: input, shape index: {}]   ;;  %s294_s1 = inlined_call_operand.hbm [shape: f32[8,128], index: 1, kind: input, shape index: {}]   ;;  %s295_s2 = inlined_call_operand.hbm [shape: f32[8,128], index: 2, kind: input, shape index: {}]   ;;  %s296_s3 = inlined_call_operand.hbm [shape: f32[8,128], index: 3, kind: output, shape index: {}]  }
   0x1   :  { %9 = vsyncpa [#allocation6], 0 }
   0x2   :  { %10 = vsyncpa [#allocation4], 0  ;;  %s219_s12 = smov [#allocation5]   ;;  %s220_s14 = smov [#allocation2]  }
   0x3   :  { %s27_s13 = sshll.u32 %s219_s12, 4  ;;  %s17_s15 = sshll.u32 %s220_s14, 4  ;;  %s28_s13 = int_to_ptr.vmem [resolvable:$true] %s27_s13  ;;  %s18_s15 = int_to_ptr.vmem [resolvable:$true] %s17_s15 }
   0x4   :  { %s125_s18 = scalar_lea.hbm %s294_s1, 128 }
   0x5   :  { %p126_p0 = scmp.ne.s32.totalorder %s294_s1, %s125_s18  ;;  %p129_p1 = scmp.lt.u32.totalorder %s125_s18, %s294_s1 }
   0x7   :  { %p131_p2 = pnand %p129_p1, %p126_p0 }
   0x9   :  { %134 = shalt.err (!%p131_p2)
}
   0xa   :  { %s135_s23 = scalar_lea.vmem %s28_s13, 128  ;;  %p140_p4 = scmp.lt.s32.totalorder %s28_s13, %s28_s13 }
   0xb   :  { %p136_p3 = scmp.ne.s32.totalorder %s28_s13, %s135_s23  ;;  %p141_p5 = scmp.lt.s32.totalorder %s135_s23, %s135_s23 }
   0xd   :  { %p142_p6 = por %p141_p5, %p140_p4 }
   0xf   :  { %p143_p7 = pnand %p142_p6, %p136_p3 }
  0x11   :  { %146 = shalt.err (!%p143_p7)
}
  0x12   :  { %30 = dma.hbm_to_vmem [thread:$0]  %s294_s1, 128, %s28_s13, [#allocation6]  }
  0x13   :  { %s147_s28 = scalar_lea.hbm %s293_s0, 128 }
  0x14   :  { %p148_p8 = scmp.ne.s32.totalorder %s293_s0, %s147_s28  ;;  %p151_p9 = scmp.lt.u32.totalorder %s147_s28, %s293_s0 }
  0x16   :  { %p153_p10 = pnand %p151_p9, %p148_p8 }
  0x18   :  { %156 = shalt.err (!%p153_p10)
}
  0x19   :  { %s157_s6 = scalar_lea.vmem %s18_s15, 128  ;;  %p162_p12 = scmp.lt.s32.totalorder %s18_s15, %s18_s15 }
  0x1a   :  { %p158_p11 = scmp.ne.s32.totalorder %s18_s15, %s157_s6  ;;  %p163_p13 = scmp.lt.s32.totalorder %s157_s6, %s157_s6 }
  0x1c   :  { %p164_p0 = por %p163_p13, %p162_p12 }
  0x1e   :  { %p165_p1 = pnand %p164_p0, %p158_p11 }
  0x20   :  { %168 = shalt.err (!%p165_p1)
}
  0x21   :  { %20 = dma.hbm_to_vmem [thread:$0]  %s293_s0, 128, %s18_s15, [#allocation3]  }
  0x22   :  { %s221_s8 = smov [#allocation7]   ;;  %s169_s12 = scalar_lea.hbm %s295_s2, 128 }
  0x23   :  { %s37_s9 = sshll.u32 %s221_s8, 4  ;;  %p170_p2 = scmp.ne.s32.totalorder %s295_s2, %s169_s12  ;;  %s38_s9 = int_to_ptr.vmem [resolvable:$true] %s37_s9 }
  0x24   :  { %p173_p3 = scmp.lt.u32.totalorder %s169_s12, %s295_s2 }
  0x26   :  { %p175_p4 = pnand %p173_p3, %p170_p2 }
  0x28   :  { %178 = shalt.err (!%p175_p4)
}
  0x29   :  { %s179_s18 = scalar_lea.vmem %s38_s9, 128  ;;  %p184_p6 = scmp.lt.s32.totalorder %s38_s9, %s38_s9 }
  0x2a   :  { %p180_p5 = scmp.ne.s32.totalorder %s38_s9, %s179_s18  ;;  %p185_p7 = scmp.lt.s32.totalorder %s179_s18, %s179_s18 }
  0x2c   :  { %p186_p8 = por %p185_p7, %p184_p6 }
  0x2e   :  { %p187_p9 = pnand %p186_p8, %p180_p5 }
  0x30   :  { %190 = shalt.err (!%p187_p9)
}
  0x31   :  { %40 = dma.hbm_to_vmem [thread:$0]  %s295_s2, 128, %s38_s9, [#allocation6]  }
  0x32   :  { %213 = dma.done.wait [#allocation3], 128  }
  0x33   :  { %214 = vsyncadd [#allocation3], 4294967168 }
  0x34   :  { %215 = dma.done.wait [#allocation6], 256  }
  0x35   :  { %216 = vsyncadd [#allocation6], 4294967040  ;;  %v51_v0 = vld [vmem:[#allocation7] sm:$0xff]  ;;  %v113_v1 = vld [vmem:[#allocation2] ss:$0 sm:$0xff]  ;;  %s222_s19 = smov 2  }
  0x36   :  { %v50_v2 = vld [vmem:[#allocation5] sm:$0xff]  ;;  %v73_v3 = vmul.f32 %v113_v1, %v51_v0  ;;  %s223_s20 = smov 126   ;;  %v116_v4 = vld [vmem:[#allocation2 + $0x4] ss:$0 sm:$0xff]  ;;  %v114_v12 = vld [vmem:[#allocation2 + $0x2] ss:$0 sm:$0xff] }
  0x37   :  { %76 = vrot.lane.b32.xlu1 %v50_v2, %s222_s19  ;;  %vm72_vm0 = vcmp.gt.f32.partialorder %v116_v4, 0.5  ;;  %v115_v20 = vld [vmem:[#allocation2 + $0x3] ss:$0 sm:$0xff]  ;;  %s224_s2 = smov [#allocation8]  }
  0x38   :  { %83 = vrot.lane.b32.xlu0 %v73_v3, %s223_s20  ;;  %s103_s21 = sshll.u32 %s224_s2, 4  ;;  %s104_s21 = int_to_ptr.vmem [resolvable:$true] %s103_s21 }
  0x39   :  { %s191_s22 = scalar_lea.vmem %s104_s21, 128  ;;  %p196_p11 = scmp.lt.s32.totalorder %s104_s21, %s104_s21 }
  0x3a   :  { %p192_p10 = scmp.ne.s32.totalorder %s104_s21, %s191_s22  ;;  %p197_p12 = scmp.lt.s32.totalorder %s191_s22, %s191_s22 }
  0x3b   :  { %85 = vrot.lane.b32.xlu1 %v73_v3, %s222_s19 }
  0x3c   :  { %74 = vrot.lane.b32.xlu0 %v50_v2, %s223_s20  ;;  %p198_p13 = por %p197_p12, %p196_p11 }
  0x3e   :  { %p199_p0 = pnand %p198_p13, %p192_p10 }
  0xa9   :  { %v77_v7 = vpop.permute.xlu1 %76 }
  0xaa   :  { %v84_v5 = vpop.permute.xlu0 %83 }
  0xab   :  { %v88_v6 = vsel %vm72_vm0, %v84_v5, %v73_v3 }
  0xac   :  { %v91_v8 = vmul.f32 1.442695, %v88_v6 }
  0xad   :  { %v86_v13 = vpop.permute.xlu1 %85 }
  0xae   :  { %123 = vpow2.f32 %v91_v8  ;;  %v75_v9 = vpop.permute.xlu0 %74  ;;  %v87_v16 = vsel %vm72_vm0, %v73_v3, %v86_v13 }
  0xaf   :  { %v78_v10 = vsel %vm72_vm0, %v75_v9, %v77_v7 }
  0xb0   :  { %v81_v11 = vsub.f32 %v78_v10, %v50_v2  ;;  %v79_v14 = vadd.f32 %v78_v10, %v50_v2 }
  0xb2   :  { %v82_v15 = vmul.f32 %v114_v12, %v81_v11  ;;  %v80_v17 = vmul.f32 0.5, %v79_v14 }
  0xb4   :  { %v89_v18 = vmul.f32 %v87_v16, %v82_v15 }
  0xb6   :  { %v90_v22 = vadd.f32 %v89_v18, %v80_v17 }
  0xb8   :  { %v124_v19 = vpop.eup %123 }
  0xb9   :  { %v93_v21 = vmul.f32 %v124_v19, %v82_v15 }
  0xbb   :  { %v94_v23 = vmul.f32 %v115_v20, %v93_v21 }
  0xbd   :  { %v95_v24 = vadd.f32 %v94_v23, %v90_v22 }
  0xbf   :  { %96 = vst [vmem:[#allocation8] sm:$0xff] %v95_v24 }
  0xc0   :  { %202 = shalt.err (!%p199_p0)
}
  0xc1   :  { %s203_s25 = scalar_lea.hbm %s296_s3, 128 }
  0xc2   :  { %p204_p1 = scmp.ne.s32.totalorder %s296_s3, %s203_s25  ;;  %p207_p2 = scmp.lt.u32.totalorder %s203_s25, %s296_s3 }
  0xc4   :  { %p209_p3 = pnand %p207_p2, %p204_p1 }
  0xc6   :  { %212 = shalt.err (!%p209_p3)
}
  0xc7   :  { %106 = dma.vmem_to_hbm [thread:$0]  %s104_s21, 128, %s296_s3, [#allocation4]  }
  0xc8   :  { %217 = dma.done.wait [#allocation4], 128  }
  0xc9   :  { %218 = vsyncadd [#allocation4], 4294967168 }
  0xca   :  { %110 = vsyncpa [#allocation3], 1 }
  0xcb   :  { %111 = vsyncpa [#allocation6], 1 }
  0xcc   :  { %112 = vsyncpa [#allocation4], 1 }

</bundles_post_ra>
